<compile_context>
chip_gen: v7x
topology: tpu7x:2x2x1
jax: 0.10.0
libtpu: 0.0.40
codegen_flags: <defaults>
</compile_context>

<pallas_src>
import functools

import jax
import jax.numpy as jnp
from jax.experimental import pallas as pl
from jax.experimental.pallas import tpu as pltpu

_MIB = 1024 * 1024


def _cdiv(a, b):
    return -(-a // b)


def _tpu_hw_info():
    """Best-effort (tensorcores_per_chip, vmem_bytes_per_core); conservative fallbacks."""
    cores, vmem = 1, 64 * _MIB          # v7x-safe defaults if detection fails
    try:
        info = pltpu.get_tpu_info()
        for name in ("vmem_capacity_bytes", "vmem_bytes", "vmem_size_bytes"):
            v = getattr(info, name, None)
            if v:
                vmem = int(v)
                break
        for name in ("num_cores", "core_count", "num_tensorcores",
                     "tensorcores_per_chip", "num_tensor_cores"):
            c = getattr(info, name, None)
            if c:
                cores = int(c)
                break
        if "V7" in str(getattr(info, "chip_version", "")).upper():
            cores = max(cores, 2)
            vmem = min(vmem, 64 * _MIB)
    except Exception:
        pass
    try:
        kind = jax.devices()[0].device_kind.lower()
        if "v7" in kind:
            cores = max(cores, 2)
            vmem = min(vmem, 64 * _MIB)
    except Exception:
        pass
    return max(1, int(cores)), int(vmem)


def _contrastive_loss_kernel(x1_ref, x2_ref, label_ref, out_ref, acc_ref, *,
                             margin, tiles_per_core):
    i = pl.program_id(1)                 # batch-tile reduction axis ("arbitrary")

    @pl.when(i == 0)
    def _():
        acc_ref[...] = jnp.zeros_like(acc_ref)

    # Native-dtype DMA; compute in f32 (v5e VPU has no bf16 math).
    x1 = x1_ref[...].astype(jnp.float32)            # (tb, D)
    x2 = x2_ref[...].astype(jnp.float32)            # (tb, D)
    lab = label_ref[...].astype(jnp.float32)        # (1, tb)  lane-dense

    eps = 1e-6                                      # F.pairwise_distance eps (added to the difference)
    diff = x1 - x2 + eps
    sq = jnp.sum(diff * diff, axis=-1, keepdims=True)   # (tb, 1)  squared distance
    dist = jnp.sqrt(sq)
    hinge = jnp.maximum(margin - dist, 0.0)
    hsq = hinge * hinge                                  # (tb, 1)

    # Per-row label weighting via two tiny (1,tb)x(tb,1) dots on the idle MXU:
    # keeps the label DMA lane-dense and avoids any cross-lane transpose.
    part = (jnp.dot(1.0 - lab, sq,
                    precision=jax.lax.Precision.HIGHEST,
                    preferred_element_type=jnp.float32)
            + jnp.dot(lab, hsq,
                      precision=jax.lax.Precision.HIGHEST,
                      preferred_element_type=jnp.float32))   # (1, 1)
    acc_ref[...] += part

    @pl.when(i == tiles_per_core - 1)
    def _():
        # Lane-dense (8,128) output block per core; wrapper picks element [c*8, 0].
        out_ref[...] = jnp.broadcast_to(acc_ref[...], out_ref.shape)


def contrastive_loss(output1, output2, label, margin=2.0,
                     block_rows=None, num_core_splits=None):
    """output1/output2: (B, D) float features (any float dtype), label: (B,), (B,1) or (1,B).
    Returns scalar float32 loss, matching the PyTorch ContrastiveLoss forward."""
    B, D = output1.shape
    label = jnp.reshape(label, (1, B)).astype(jnp.float32)   # lane-dense label layout

    cores, vmem_cap = _tpu_hw_info()
    itemsize = jnp.dtype(output1.dtype).itemsize
    d_pad = _cdiv(D, 128) * 128                 # lanes a (tb, D) block actually occupies
    vmem_row_bytes = d_pad * itemsize           # per-row VMEM footprint of one feature buffer

    # VMEM working set per batch row:
    #   2 feature inputs x 2 pipeline buffers (native dtype)
    # + ~4 tile-sized f32 temporaries (f32 casts, diff, diff^2)
    # + lane-padded label double buffers (tiny).
    ws_row_bytes = 4 * vmem_row_bytes + 4 * d_pad * 4 + 64
    budget = min(vmem_cap - 16 * _MIB, (vmem_cap * 3) // 4)   # leave Mosaic headroom

    if block_rows is None:
        # Per-feature-input VMEM tile target; larger on 2-TC chips (v7x, ~3.2 TB/s)
        # to amortize the ~0.35 us per-grid-step overhead.
        target_tile_bytes = (8 if cores >= 2 else 4) * _MIB
        tb = (target_tile_bytes // vmem_row_bytes) // 128 * 128
    else:
        tb = (max(128, int(block_rows)) // 128) * 128         # 128: label (1, tb) lane rule
    tb_budget = (max(0, budget) // ws_row_bytes) // 128 * 128
    tb = int(max(128, min(tb, tb_budget)))

    nc = int(num_core_splits) if num_core_splits else (2 if cores >= 2 else 1)

    if B <= tb:
        # Single full-extent tile: blocks equal full array dims, no padding needed.
        tb, nc, tiles_per_core, pad = B, 1, 1, 0
    else:
        n_tiles = _cdiv(B, tb)
        nc = max(1, min(nc, n_tiles))
        tiles_per_core = _cdiv(n_tiles, nc)
        steps = nc * tiles_per_core
        # Spread rows evenly over the chosen number of grid steps (bounds padding
        # waste to <128 rows per step) while keeping tb a multiple of 128.
        tb = _cdiv(_cdiv(B, steps), 128) * 128
        pad = steps * tb - B

    if pad:
        # Self-cancelling padding rows: dist >= |margin|+1 > margin so the hinge term
        # is exactly 0, and label=1 makes (1-label)*d^2 exactly 0.  No in-kernel mask.
        pad_val = float(abs(float(margin)) + 1.0)
        output1 = jnp.pad(output1, ((0, pad), (0, 0)), constant_values=pad_val)
        output2 = jnp.pad(output2, ((0, pad), (0, 0)))
        label = jnp.pad(label, ((0, 0), (0, pad)), constant_values=1.0)

    ws_bytes = tb * ws_row_bytes + 64 * 1024
    vmem_limit = int(min(vmem_cap - 4 * _MIB, max(16 * _MIB, ws_bytes + 8 * _MIB)))

    kernel = functools.partial(
        _contrastive_loss_kernel,
        margin=float(margin),
        tiles_per_core=tiles_per_core,
    )

    feat_map = lambda c, i: (c * tiles_per_core + i, 0)
    lab_map = lambda c, i: (0, c * tiles_per_core + i)

    # NOTE(v7x): if a trace shows one TensorCore idle, switch the leading axis to
    # pltpu.CORE_PARALLEL (or drive the split via pl.core_map) — plain "parallel"
    # is the portable default and is a no-op on single-TC v5e/v6e.
    partial_sums = pl.pallas_call(
        kernel,
        out_shape=jax.ShapeDtypeStruct((nc * 8, 128), jnp.float32),
        grid_spec=pltpu.PrefetchScalarGridSpec(
            num_scalar_prefetch=0,
            grid=(nc, tiles_per_core),
            in_specs=[
                pl.BlockSpec((tb, D), feat_map),
                pl.BlockSpec((tb, D), feat_map),
                pl.BlockSpec((1, tb), lab_map),      # lane-dense label DMA
            ],
            out_specs=pl.BlockSpec((8, 128), lambda c, i: (c, 0)),
            scratch_shapes=[pltpu.VMEM((1, 1), jnp.float32)],
        ),
        compiler_params=pltpu.CompilerParams(
            dimension_semantics=("parallel", "arbitrary"),
            vmem_limit_bytes=vmem_limit,
        ),
    )(output1, output2, label)

    per_core_sums = partial_sums[0::8, 0]             # one partial sum per core split
    return jnp.sum(per_core_sums) / jnp.float32(B)    # mean over the TRUE batch


def _reference_loss(output1, output2, label, margin=2.0):
    # Pure-JAX reference mirroring the PyTorch module exactly.
    eps = 1e-6
    o1 = output1.astype(jnp.float32)
    o2 = output2.astype(jnp.float32)
    lab = jnp.reshape(label, (-1, 1)).astype(jnp.float32)
    dist = jnp.sqrt(jnp.sum((o1 - o2 + eps) ** 2, axis=-1, keepdims=True))
    return jnp.mean((1.0 - lab) * dist ** 2 + lab * jnp.clip(margin - dist, 0.0) ** 2)


if __name__ == "__main__":
    key = jax.random.PRNGKey(0)
    k1, k2, k3, k4, k5, k6 = jax.random.split(key, 6)

    # Case 1: module-consistent small shapes (single full-extent tile, no padding).
    B, D = 8, 32
    o1 = jax.random.normal(k1, (B, D), dtype=jnp.float32)
    o2 = jax.random.normal(k2, (B, D), dtype=jnp.float32)
    lab = jax.random.bernoulli(k3, 0.5, (B, 1)).astype(jnp.float32)
    loss = jax.block_until_ready(contrastive_loss(o1, o2, lab, margin=2.0))
    ref = _reference_loss(o1, o2, lab, margin=2.0)
    assert jnp.allclose(loss, ref, rtol=1e-5, atol=1e-5), (loss, ref)

    # Case 2: exercises the tiled / padded / 2-way core-split accumulator path.
    B2, D2 = 300, 64
    o1b = jax.random.normal(k4, (B2, D2), dtype=jnp.float32)
    o2b = jax.random.normal(k5, (B2, D2), dtype=jnp.float32)
    labb = jax.random.bernoulli(k6, 0.5, (B2, 1)).astype(jnp.float32)
    loss2 = jax.block_until_ready(
        contrastive_loss(o1b, o2b, labb, margin=2.0,
                         block_rows=128, num_core_splits=2))
    ref2 = _reference_loss(o1b, o2b, labb, margin=2.0)
    assert jnp.allclose(loss2, ref2, rtol=1e-5, atol=1e-5), (loss2, ref2)

    # Case 3: native bf16 DMA with in-kernel f32 compute (half the HBM traffic).
    o1c = o1.astype(jnp.bfloat16)
    o2c = o2.astype(jnp.bfloat16)
    loss3 = jax.block_until_ready(contrastive_loss(o1c, o2c, lab, margin=2.0))
    ref3 = _reference_loss(o1c, o2c, lab, margin=2.0)
    assert jnp.allclose(loss3, ref3, rtol=1e-5, atol=1e-5), (loss3, ref3)

    print("KERNEL_OK")
</pallas_src>

<mosaic_0001>
module attributes {stable_mosaic.version = 11 : i64} {
  func.func @_contrastive_loss_kernel(%arg0: i32, %arg1: i32, %arg2: memref<8x32xf32, #tpu.memory_space<vmem>>, %arg3: memref<8x32xf32, #tpu.memory_space<vmem>>, %arg4: memref<1x8xf32, #tpu.memory_space<vmem>>, %arg5: memref<8x128xf32, #tpu.memory_space<vmem>>, %arg6: memref<1x1xf32, #tpu.memory_space<vmem>>) attributes {dimension_semantics = [#tpu.dimension_semantics<parallel>, #tpu.dimension_semantics<arbitrary>], iteration_bounds = array<i64: 1, 1>, scalar_prefetch = 0 : i64, scratch_operands = 1 : i64, tpu.core_type = #tpu.core_type<tc>, window_params = [{transform_indices = @transform_0, window_bounds = array<i64: 8, 32>}, {transform_indices = @transform_1, window_bounds = array<i64: 8, 32>}, {transform_indices = @transform_2, window_bounds = array<i64: 1, 8>}, {transform_indices = @transform_3, window_bounds = array<i64: 8, 128>}]} {
    %c0_i32 = arith.constant 0 : i32
    %0 = arith.cmpi eq, %arg1, %c0_i32 : i32
    %1 = arith.extui %0 : i1 to i32
    %c0_i32_0 = arith.constant 0 : i32
    %2 = arith.cmpi ne, %1, %c0_i32_0 : i32
    scf.if %2 {
      %cst_18 = arith.constant 0.000000e+00 : f32
      %29 = vector.broadcast %cst_18 : f32 to vector<1x1xf32>
      %c0_19 = arith.constant 0 : index
      %c0_20 = arith.constant 0 : index
      %30 = vector.load %arg6[%c0_19, %c0_20] : memref<1x1xf32, #tpu.memory_space<vmem>>, vector<1x1xf32>
      tpu.vector_store %arg6[%c0_19, %c0_20], %29 {strides = array<i32>} : memref<1x1xf32, #tpu.memory_space<vmem>>, vector<1x1xf32>,
    } else {
    }
    %c0 = arith.constant 0 : index
    %c0_1 = arith.constant 0 : index
    %3 = vector.load %arg2[%c0, %c0_1] : memref<8x32xf32, #tpu.memory_space<vmem>>, vector<8x32xf32>
    %c0_2 = arith.constant 0 : index
    %c0_3 = arith.constant 0 : index
    %4 = vector.load %arg3[%c0_2, %c0_3] : memref<8x32xf32, #tpu.memory_space<vmem>>, vector<8x32xf32>
    %c0_4 = arith.constant 0 : index
    %c0_5 = arith.constant 0 : index
    %5 = vector.load %arg4[%c0_4, %c0_5] : memref<1x8xf32, #tpu.memory_space<vmem>>, vector<1x8xf32>
    %6 = arith.subf %3, %4 : vector<8x32xf32>
    %cst = arith.constant 9.99999997E-7 : f32
    %7 = vector.broadcast %cst : f32 to vector<8x32xf32>
    %8 = arith.addf %6, %7 : vector<8x32xf32>
    %9 = arith.mulf %8, %8 : vector<8x32xf32>
    %cst_6 = arith.constant dense<0.000000e+00> : vector<8xf32>
    %10 = vector.multi_reduction <add>, %9, %cst_6 [1] : vector<8x32xf32> to vector<8xf32>
    %11 = vector.shape_cast %10 : vector<8xf32> to vector<8x1xf32>
    %12 = math.sqrt %11 : vector<8x1xf32>
    %cst_7 = arith.constant 2.000000e+00 : f32
    %13 = vector.broadcast %cst_7 : f32 to vector<8x1xf32>
    %14 = arith.subf %13, %12 : vector<8x1xf32>
    %cst_8 = arith.constant 0.000000e+00 : f32
    %15 = vector.broadcast %cst_8 : f32 to vector<8x1xf32>
    %16 = arith.maximumf %14, %15 : vector<8x1xf32>
    %17 = arith.mulf %16, %16 : vector<8x1xf32>
    %cst_9 = arith.constant 1.000000e+00 : f32
    %18 = vector.broadcast %cst_9 : f32 to vector<1x8xf32>
    %19 = arith.subf %18, %5 : vector<1x8xf32>
    %cst_10 = arith.constant dense<0.000000e+00> : vector<1x1xf32>
    %20 = tpu.matmul %19, %11, %cst_10 {dimension_numbers = #tpu.dot_dimension_numbers<[1], [0], [0], [1], [0, 0, 1, 1], [], []>, precision = #tpu.contract_precision<fp32>} : vector<1x8xf32>, vector<8x1xf32>, vector<1x1xf32> -> vector<1x1xf32>
    %cst_11 = arith.constant dense<0.000000e+00> : vector<1x1xf32>
    %21 = tpu.matmul %5, %17, %cst_11 {dimension_numbers = #tpu.dot_dimension_numbers<[1], [0], [0], [1], [0, 0, 1, 1], [], []>, precision = #tpu.contract_precision<fp32>} : vector<1x8xf32>, vector<8x1xf32>, vector<1x1xf32> -> vector<1x1xf32>
    %22 = arith.addf %20, %21 : vector<1x1xf32>
    %c0_12 = arith.constant 0 : index
    %c0_13 = arith.constant 0 : index
    %23 = vector.load %arg6[%c0_12, %c0_13] : memref<1x1xf32, #tpu.memory_space<vmem>>, vector<1x1xf32>
    %24 = arith.addf %23, %22 : vector<1x1xf32>
    %c0_14 = arith.constant 0 : index
    %c0_15 = arith.constant 0 : index
    %25 = vector.load %arg6[%c0_14, %c0_15] : memref<1x1xf32, #tpu.memory_space<vmem>>, vector<1x1xf32>
    tpu.vector_store %arg6[%c0_14, %c0_15], %24 {strides = array<i32>} : memref<1x1xf32, #tpu.memory_space<vmem>>, vector<1x1xf32>,
    %c0_i32_16 = arith.constant 0 : i32
    %26 = arith.cmpi eq, %arg1, %c0_i32_16 : i32
    %27 = arith.extui %26 : i1 to i32
    %c0_i32_17 = arith.constant 0 : i32
    %28 = arith.cmpi ne, %27, %c0_i32_17 : i32
    scf.if %28 {
      %c0_18 = arith.constant 0 : index
      %c0_19 = arith.constant 0 : index
      %29 = vector.load %arg6[%c0_18, %c0_19] : memref<1x1xf32, #tpu.memory_space<vmem>>, vector<1x1xf32>
      %30 = vector.shape_cast %29 : vector<1x1xf32> to vector<1x1xf32>
      %31 = vector.broadcast %30 : vector<1x1xf32> to vector<8x128xf32>
      %c0_20 = arith.constant 0 : index
      %c0_21 = arith.constant 0 : index
      %32 = vector.load %arg5[%c0_20, %c0_21] : memref<8x128xf32, #tpu.memory_space<vmem>>, vector<8x128xf32>
      tpu.vector_store %arg5[%c0_20, %c0_21], %31 {strides = array<i32>} : memref<8x128xf32, #tpu.memory_space<vmem>>, vector<8x128xf32>,
    } else {
    }
    return
  }
  func.func @transform_0(%arg0: i32, %arg1: i32) -> (i32, i32) {
    %c1_i32 = arith.constant 1 : i32
    %0 = arith.muli %arg0, %c1_i32 : i32
    %1 = arith.addi %0, %arg1 : i32
    %c0_i32 = arith.constant 0 : i32
    %c0_i32_0 = arith.constant 0 : i32
    return %1, %c0_i32 : i32, i32
  }
  func.func @transform_1(%arg0: i32, %arg1: i32) -> (i32, i32) {
    %c1_i32 = arith.constant 1 : i32
    %0 = arith.muli %arg0, %c1_i32 : i32
    %1 = arith.addi %0, %arg1 : i32
    %c0_i32 = arith.constant 0 : i32
    %c0_i32_0 = arith.constant 0 : i32
    return %1, %c0_i32 : i32, i32
  }
  func.func @transform_2(%arg0: i32, %arg1: i32) -> (i32, i32) {
    %c1_i32 = arith.constant 1 : i32
    %0 = arith.muli %arg0, %c1_i32 : i32
    %1 = arith.addi %0, %arg1 : i32
    %c0_i32 = arith.constant 0 : i32
    %c0_i32_0 = arith.constant 0 : i32
    return %c0_i32, %1 : i32, i32
  }
  func.func @transform_3(%arg0: i32, %arg1: i32) -> (i32, i32) {
    %c0_i32 = arith.constant 0 : i32
    %c0_i32_0 = arith.constant 0 : i32
    return %arg0, %c0_i32 : i32, i32
  }
}

</mosaic_0001>

<bundles_post_ra>
// kernel: tpu_custom_call.1
= control target key start
LH: loop header
LB: loop body
LE: loop exit
PB: predicated region body
PF: predicated region fallthrough
CT: control target
= control target key end

     0   :  { %8 = vsyncpa [#allocation4], 0  ;;  %s1294_s0 = inlined_call_operand.hbm [shape: f32[8,32], index: 0, kind: input, shape index: {}]   ;;  %s1295_s1 = inlined_call_operand.hbm [shape: f32[8,32], index: 1, kind: input, shape index: {}]   ;;  %s1296_s2 = inlined_call_operand.vmem [shape: f32[1,8], index: 2, kind: input, shape index: {}]   ;;  %s1297_s3 = inlined_call_operand.hbm [shape: f32[8,128], index: 3, kind: output, shape index: {}]  }
   0x1   :  { %9 = vsyncpa [#allocation7], 0 }
   0x2   :  { %10 = vsyncpa [#allocation5], 0  ;;  %s1190_s12 = smov [#allocation3]   ;;  %s1191_s14 = smov [#allocation6]  }
   0x3   :  { %s20_s13 = sshll.u32 %s1190_s12, 4  ;;  %s33_s15 = sshll.u32 %s1191_s14, 4  ;;  %s21_s13 = int_to_ptr.vmem [resolvable:$true] %s20_s13  ;;  %s34_s15 = int_to_ptr.vmem [resolvable:$true] %s33_s15 }
   0x4   :  { %s1118_s18 = scalar_lea.hbm %s1294_s0, 128 }
   0x5   :  { %p1119_p0 = scmp.ne.s32.totalorder %s1294_s0, %s1118_s18  ;;  %p1122_p1 = scmp.lt.u32.totalorder %s1118_s18, %s1294_s0 }
   0x7   :  { %p1124_p2 = pnand %p1122_p1, %p1119_p0 }
   0x9   :  { %1127 = shalt.err (!%p1124_p2)
}
   0xa   :  { %s1128_s23 = scalar_lea.vmem %s21_s13, 128  ;;  %p1133_p4 = scmp.lt.s32.totalorder %s21_s13, %s21_s13 }
   0xb   :  { %p1129_p3 = scmp.ne.s32.totalorder %s21_s13, %s1128_s23  ;;  %p1134_p5 = scmp.lt.s32.totalorder %s1128_s23, %s1128_s23 }
   0xd   :  { %p1135_p6 = por %p1134_p5, %p1133_p4 }
   0xf   :  { %p1136_p7 = pnand %p1135_p6, %p1129_p3 }
  0x11   :  { %1139 = shalt.err (!%p1136_p7)
}
  0x12   :  { %23 = dma.hbm_to_vmem [thread:$0]  %s1294_s0, 128, %s21_s13, [#allocation4]  }
  0x13   :  { %s1140_s28 = scalar_lea.hbm %s1295_s1, 128 }
  0x14   :  { %p1141_p8 = scmp.ne.s32.totalorder %s1295_s1, %s1140_s28  ;;  %p1144_p9 = scmp.lt.u32.totalorder %s1140_s28, %s1295_s1 }
  0x16   :  { %p1146_p10 = pnand %p1144_p9, %p1141_p8 }
  0x18   :  { %1149 = shalt.err (!%p1146_p10)
}
  0x19   :  { %s1150_s6 = scalar_lea.vmem %s34_s15, 128  ;;  %p1155_p12 = scmp.lt.s32.totalorder %s34_s15, %s34_s15 }
  0x1a   :  { %p1151_p11 = scmp.ne.s32.totalorder %s34_s15, %s1150_s6  ;;  %p1156_p13 = scmp.lt.s32.totalorder %s1150_s6, %s1150_s6 }
  0x1c   :  { %p1157_p0 = por %p1156_p13, %p1155_p12 }
  0x1e   :  { %p1158_p1 = pnand %p1157_p0, %p1151_p11 }
  0x20   :  { %1161 = shalt.err (!%p1158_p1)
}
  0x21   :  { %36 = dma.hbm_to_vmem [thread:$0]  %s1295_s1, 128, %s34_s15, [#allocation7]  }
  0x22   :  { %1184 = dma.done.wait [#allocation4], 128  }
  0x23   :  { %1185 = vsyncadd [#allocation4], 4294967168 }
  0x24   :  { %1186 = dma.done.wait [#allocation7], 128  }
  0x25   :  { %1187 = vsyncadd [#allocation7], 4294967168  ;;  %v67_v0 = vld [vmem:[#allocation3] sm:$0xff]  ;;  %v68_v1 = vld [vmem:[#allocation6] sm:$0xff]  ;;  %vm73_vm0 = vcmask 261120   ;;  %v1192_v6 = vmov 0.0  }
  0x26   :  { %v70_v2 = vsub.f32 %v67_v0, %v68_v1  ;;  %1049 = vmatprep.subr.mxu0 %v1192_v6  ;;  %1054 = vmatprep.subr.mxu1 %v1192_v6  ;;  %vm1193_vm1 = vmmov 0   ;;  %v69_v7 = vld [vmem:[%s1296_s2] sm:$0x1]  ;;  %vm88_vm2 = vcmask 64512   ;;  %vm65_vm5 = vcmask 0   ;;  %s1195_s2 = smov [#allocation8]  }
  0x27   :  { %1051 = vmatprep.mubr.msk.f32.mxu0 %vm1193_vm1, %v1192_v6  ;;  %1056 = vmatprep.mubr.msk.f32.mxu1 %vm1193_vm1, %v1192_v6  ;;  %v90_v9 = vsel %vm88_vm2, %v69_v7, 0  ;;  %v87_v13 = vsub.f32 1.0, %v69_v7  ;;  %66 = vst.msk [vmem:[#allocation2] sm:$0x1] %vm65_vm5, %v1192_v6  ;;  %v1194_v40 = vmov 0   ;;  %s1011_s9 = sshll.u32 %s1195_s2, 4  ;;  %s1012_s9 = int_to_ptr.vmem [resolvable:$true] %s1011_s9 }
  0x28   :  { %v71_v3 = vadd.f32 1e-06, %v70_v2  ;;  %v158_v10 = vand.u32 4294901760, %v90_v9  ;;  %1115 = vset.pattern.permute.xlu0 %v1194_v40  ;;  %s1162_s10 = scalar_lea.vmem %s1012_s9, 128  ;;  %p1167_p3 = scmp.lt.s32.totalorder %s1012_s9, %s1012_s9 }
  0x29   :  { %v539_v19 = vsel %vm88_vm2, %v87_v13, 0  ;;  %p1163_p2 = scmp.ne.s32.totalorder %s1012_s9, %s1162_s10  ;;  %p1168_p4 = scmp.lt.s32.totalorder %s1162_s10, %s1162_s10 }
  0x2a   :  { %v72_v4 = vmul.f32 %v71_v3, %v71_v3  ;;  %v159_v11 = vsub.f32 %v90_v9, %v158_v10  ;;  %v607_v23 = vand.u32 4294901760, %v539_v19 }
  0x2b   :  { %p1169_p5 = por %p1168_p4, %p1167_p3 }
  0x2c   :  { %v74_v5 = vsel %vm73_vm0, %v72_v4, 0.0  ;;  %v160_v16 = vand.u32 4294901760, %v159_v11  ;;  %v608_v27 = vsub.f32 %v539_v19, %v607_v23 }
  0x2d   :  { %75 = vadd.xlane.f32.xlu0 %v74_v5  ;;  %p1170_p6 = pnand %p1169_p5, %p1163_p2 }
  0x2e   :  { %v161_v21 = vsub.f32 %v159_v11, %v160_v16  ;;  %v609_v31 = vand.u32 4294901760, %v608_v27 }
  0x30   :  { %v162_v25 = vand.u32 4294901760, %v161_v21  ;;  %v610_v35 = vsub.f32 %v608_v27, %v609_v31 }
  0x32   :  { %v611_v37 = vand.u32 4294901760, %v610_v35 }
  0xba   :  { %v76_v8 = vpop.xlane.xlu0 %75 }
  0xbb   :  { %1116 = vrsqrt.f32 %v76_v8  ;;  %vm79_vm3 = vcmp.eq.f32.partialorder %v76_v8, inf  ;;  %v82_v15 = vand.u32 2147483648, %v76_v8  ;;  %vm81_vm4 = vcmp.eq.f32.partialorder %v76_v8, 0.0 }
  0xbc   :  { %v542_v29 = vand.u32 4294901760, %v76_v8 }
  0xbe   :  { %v619_v33 = vsub.f32 %v76_v8, %v542_v29 }
  0xc0   :  { %v620_v36 = vand.u32 4294901760, %v619_v33 }
  0xc2   :  { %v621_v38 = vsub.f32 %v619_v33, %v620_v36 }
  0xc4   :  { %v622_v39 = vand.u32 4294901760, %v621_v38 }
  0xc5   :  { %v1117_v12 = vpop.eup %1116 }
  0xc6   :  { %v78_v14 = vmul.f32 %v1117_v12, %v76_v8 }
  0xc8   :  { %v80_v17 = vsel %vm79_vm3, %v76_v8, %v78_v14 }
  0xc9   :  { %v83_v18 = vsel %vm81_vm4, %v82_v15, %v80_v17 }
  0xca   :  { %v84_v20 = vsub.f32 2.0, %v83_v18 }
  0xcc   :  { %v85_v22 = vmax.f32 %v84_v20, 0.0 }
  0xce   :  { %v86_v24 = vmul.f32 %v85_v22, %v85_v22 }
  0xd0   :  { %v93_v26 = vand.u32 4294901760, %v86_v24 }
  0xd2   :  { %1050 = vmatpush3.msra.mxu0 %v93_v26  ;;  %v170_v28 = vsub.f32 %v86_v24, %v93_v26 }
  0xd3   :  { %1052 = vmatmul.mubr.f32.vlgmr.msra.gmra.mrb[0].mxu0 %v162_v25  ;;  %1059 = vmatprep.subr.mxu0 %v1192_v6 }
  0xd4   :  { %1060 = vmatpush3.msra.mxu0 %v170_v28  ;;  %1061 = vmatprep.mubr.msk.f32.mxu0 %vm1193_vm1, %v1192_v6  ;;  %v171_v30 = vand.u32 4294901760, %v170_v28 }
  0xd5   :  { %1069 = vmatprep.subr.mxu0 %v1192_v6 }
  0xd6   :  { %v172_v32 = vsub.f32 %v170_v28, %v171_v30 }
  0xd7   :  { %1062 = vmatmul.mubr.f32.vlgmr.msra.gmra.mrb[2].mxu0 %v159_v11 }
  0xd8   :  { %1070 = vmatpush3.msra.mxu0 %v171_v30  ;;  %v173_v34 = vand.u32 4294901760, %v172_v32  ;;  %1071 = vmatprep.mubr.msk.f32.mxu0 %vm1193_vm1, %v1192_v6 }
  0xd9   :  { %1079 = vmatprep.subr.mxu0 %v1192_v6 }
  0xda   :  { %1055 = vmatpush3.msra.mxu1 %v173_v34 }
  0xdb   :  { %1057 = vmatmul.mubr.f32.vlgmr.msra.gmra.mrb[0].mxu1 %v158_v10  ;;  %1064 = vmatprep.subr.mxu1 %v1192_v6 }
  0xdc   :  { %1072 = vmatmul.mubr.f32.vlgmr.msra.gmra.mrb[4].mxu0 %v158_v10  ;;  %1065 = vmatpush3.msra.mxu1 %v93_v26 }
  0xdd   :  { %1080 = vmatpush3.msra.mxu0 %v542_v29  ;;  %1066 = vmatprep.mubr.msk.f32.mxu1 %vm1193_vm1, %v1192_v6 }
  0xde   :  { %1074 = vmatprep.subr.mxu1 %v1192_v6  ;;  %1081 = vmatprep.mubr.msk.f32.mxu0 %vm1193_vm1, %v1192_v6 }
  0xdf   :  { %1089 = vmatprep.subr.mxu0 %v1192_v6  ;;  %1067 = vmatmul.mubr.f32.vlgmr.msra.gmra.mrb[2].mxu1 %v160_v16 }
  0xe0   :  { %1075 = vmatpush3.msra.mxu1 %v93_v26  ;;  %1082 = vmatmul.mubr.f32.vlgmr.msra.gmra.mrb[6].mxu0 %v611_v37 }
  0xe1   :  { %1090 = vmatpush3.msra.mxu0 %v619_v33  ;;  %1076 = vmatprep.mubr.msk.f32.mxu1 %vm1193_vm1, %v1192_v6 }
  0xe2   :  { %1084 = vmatprep.subr.mxu1 %v1192_v6  ;;  %1091 = vmatprep.mubr.msk.f32.mxu0 %vm1193_vm1, %v1192_v6 }
  0xe3   :  { %1099 = vmatprep.subr.mxu0 %v1192_v6  ;;  %1077 = vmatmul.mubr.f32.vlgmr.msra.gmra.mrb[4].mxu1 %v158_v10  ;;  %v987_v10 = vld [vmem:[#allocation2] sm:$0x1] }
  0xe4   :  { %1085 = vmatpush3.msra.mxu1 %v622_v39  ;;  %1092 = vmatmul.mubr.f32.vlgmr.msra.gmra.mrb[8].mxu0 %v608_v27 }
  0xe5   :  { %1100 = vmatpush3.msra.mxu0 %v620_v36  ;;  %1086 = vmatprep.mubr.msk.f32.mxu1 %vm1193_vm1, %v1192_v6 }
  0xe6   :  { %1094 = vmatprep.subr.mxu1 %v1192_v6  ;;  %1101 = vmatprep.mubr.msk.f32.mxu0 %vm1193_vm1, %v1192_v6 }
  0xe7   :  { %1087 = vmatmul.mubr.f32.vlgmr.msra.gmra.mrb[6].mxu1 %v607_v23 }
  0xe8   :  { %1095 = vmatpush3.msra.mxu1 %v542_v29  ;;  %1096 = vmatprep.mubr.msk.f32.mxu1 %vm1193_vm1, %v1192_v6 }
  0xe9   :  { %1104 = vmatprep.subr.mxu1 %v1192_v6  ;;  %1102 = vmatmul.mubr.f32.vlgmr.msra.gmra.mrb[10].mxu0 %v607_v23 }
  0xeb   :  { %1097 = vmatmul.mubr.f32.vlgmr.msra.gmra.mrb[8].mxu1 %v609_v31 }
  0xec   :  { %1105 = vmatpush3.msra.mxu1 %v542_v29  ;;  %1106 = vmatprep.mubr.msk.f32.mxu1 %vm1193_vm1, %v1192_v6 }
  0xef   :  { %1107 = vmatmul.mubr.f32.vlgmr.msra.gmra.mrb[10].mxu1 %v607_v23 }
 0x1a6   :  { %v164_v41 = vpop.f32.mrb[0].mxu0 }
 0x1a7   :  { %v1053_v42 = vpop.f32.mrb[1].mxu0 }
 0x1aa   :  { %v314_v43 = vpop.f32.mrb[2].mxu0 }
 0x1ab   :  { %v1063_v44 = vpop.f32.mrb[3].mxu0 }
 0x1ae   :  { %v240_v45 = vpop.f32.mrb[0].mxu1 }
 0x1af   :  { %v241_v46 = vadd.f32 %v240_v45, %v164_v41  ;;  %v1058_v47 = vpop.f32.mrb[1].mxu1  ;;  %v462_v48 = vpop.f32.mrb[4].mxu0 }
 0x1b0   :  { %v1073_v49 = vpop.f32.mrb[5].mxu0 }
 0x1b1   :  { %v315_v50 = vadd.f32 %v314_v43, %v241_v46 }
 0x1b2   :  { %v388_v51 = vpop.f32.mrb[2].mxu1 }
 0x1b3   :  { %v389_v52 = vadd.f32 %v388_v51, %v315_v50  ;;  %v1068_v53 = vpop.f32.mrb[3].mxu1  ;;  %v613_v54 = vpop.f32.mrb[6].mxu0 }
 0x1b4   :  { %v1083_v55 = vpop.f32.mrb[7].mxu0 }
 0x1b5   :  { %v463_v56 = vadd.f32 %v462_v48, %v389_v52 }
 0x1b6   :  { %v534_v57 = vpop.f32.mrb[4].mxu1 }
 0x1b7   :  { %v535_v58 = vadd.f32 %v534_v57, %v463_v56  ;;  %v1078_v59 = vpop.f32.mrb[5].mxu1  ;;  %v763_v60 = vpop.f32.mrb[8].mxu0 }
 0x1b8   :  { %v1093_v61 = vpop.f32.mrb[9].mxu0 }
 0x1b9   :  { %v614_v62 = vadd.f32 %v613_v54, %v535_v58 }
 0x1ba   :  { %v689_v63 = vpop.f32.mrb[6].mxu1 }
 0x1bb   :  { %v690_v0 = vadd.f32 %v689_v63, %v614_v62  ;;  %v1088_v1 = vpop.f32.mrb[7].mxu1 }
 0x1bc   :  { %v911_v2 = vpop.f32.mrb[10].mxu0 }
 0x1bd   :  { %v764_v3 = vadd.f32 %v763_v60, %v690_v0  ;;  %v1103_v4 = vpop.f32.mrb[11].mxu0 }
 0x1be   :  { %v837_v5 = vpop.f32.mrb[8].mxu1 }
 0x1bf   :  { %v838_v6 = vadd.f32 %v837_v5, %v764_v3  ;;  %v1098_v7 = vpop.f32.mrb[9].mxu1 }
 0x1c1   :  { %v912_v8 = vadd.f32 %v911_v2, %v838_v6 }
 0x1c2   :  { %v983_v9 = vpop.f32.mrb[10].mxu1 }
 0x1c3   :  { %v984_v11 = vadd.f32 %v983_v9, %v912_v8  ;;  %v1108_v12 = vpop.f32.mrb[11].mxu1 }
 0x1c5   :  { %v988_v13 = vadd.f32 %v987_v10, %v984_v11 }
 0x1c7   :  { %990 = vst.msk [vmem:[#allocation2] sm:$0x1] %vm65_vm5, %v988_v13 }
 0x1ce   :  { %v1024_v14 = vld [vmem:[#allocation2] ss:$0 sm:$0xff] }
 0x1cf   :  { %1001 = vperm.xlu0 %1115, %v1024_v14  }
 0x24e   :  { %v1002_v15 = vpop.permute.xlu0 %1001 }
 0x24f   :  { %1004 = vst [vmem:[#allocation8] sm:$0xff] %v1002_v15 }
 0x250   :  { %1173 = shalt.err (!%p1170_p6)
}
 0x251   :  { %s1174_s13 = scalar_lea.hbm %s1297_s3, 128 }
 0x252   :  { %p1175_p7 = scmp.ne.s32.totalorder %s1297_s3, %s1174_s13  ;;  %p1178_p8 = scmp.lt.u32.totalorder %s1174_s13, %s1297_s3 }
 0x254   :  { %p1180_p9 = pnand %p1178_p8, %p1175_p7 }
 0x256   :  { %1183 = shalt.err (!%p1180_p9)
}
 0x257   :  { %1014 = dma.vmem_to_hbm [thread:$0]  %s1012_s9, 128, %s1297_s3, [#allocation5]  }
 0x258   :  { %1188 = dma.done.wait [#allocation5], 128  }
 0x259   :  { %1189 = vsyncadd [#allocation5], 4294967168 }
 0x25a   :  { %1018 = vsyncpa [#allocation4], 1 }
 0x25b   :  { %1019 = vsyncpa [#allocation7], 1 }
 0x25c   :  { %1020 = vsyncpa [#allocation5], 1 }

</bundles_post_ra>
